<compile_context>
chip_gen: v6e
topology: v6e:2x2x1
jax: 0.10.0
libtpu: 0.0.40
codegen_flags: <defaults>
</compile_context>

<pallas_src>
import functools

import jax
import jax.numpy as jnp
from jax.experimental import pallas as pl
from jax.experimental.pallas import tpu as pltpu

LANE = 128
BATCH_TILE = 16       # native bf16 sublane tile (16, 128)


def _round_up(n, m):
    return ((n + m - 1) // m) * m


# ---------------------------------------------------------------------------
# Kernel: one grid step == TT RNN timesteps.
#   phase 1: batched i2h for all TT steps        (time-parallel, one matmul)
#   phase 2: serial recurrence, only h @ W_hh     (the irreducible part)
#   phase 3: batched h2o over all TT hidden states (time-parallel, one matmul)
# Hidden carry lives in the resident `h_ref` output block.
# ---------------------------------------------------------------------------
def rnn_block_kernel(x_ref, h0_ref, w_ih_ref, b_h_ref, w_hh_ref, w_o_ref,
                     b_o_ref, out_ref, h_ref, hs_ref, *, seq_len, need_mask):
    tt, bp, insz = x_ref.shape
    hp = h_ref.shape[-1]
    op = out_ref.shape[-1]
    g = pl.program_id(0)

    @pl.when(g == 0)
    def _init():
        h_ref[...] = h0_ref[...]

    # -- time-parallel i2h: one (TT*Bp)-row MXU pass, off the serial path ----
    x_blk = x_ref[...].reshape(tt * bp, insz)                      # bf16
    xw = (jnp.dot(x_blk, w_ih_ref[...],
                  preferred_element_type=jnp.float32)
          + b_h_ref[...])                                          # fp32, bias fused (bi+bh)

    # -- serial recurrence: h @ W_hh + add + tanh only --------------------
    h = h_ref[...]                                                 # fp32 carry
    h_bf = h.astype(jnp.bfloat16)
    for t in range(tt):          # static unroll (== lax.fori_loop unroll=True)
        pre = (xw[t * bp:(t + 1) * bp, :]
               + jnp.dot(h_bf, w_hh_ref[...],
                         preferred_element_type=jnp.float32))
        h_new = jnp.tanh(pre)                                      # EUP, fp32
        if need_mask:            # freeze the carry on padded trailing steps
            h = jnp.where(g * tt + t < seq_len, h_new, h)
        else:
            h = h_new
        h_bf = h.astype(jnp.bfloat16)   # single per-step cast, reused twice
        hs_ref[t] = h_bf                # stash for the batched h2o
    h_ref[...] = h                      # carry to next grid step / final out

    # -- time-parallel h2o: one (TT*Bp)-row MXU pass -----------------------
    out = (jnp.dot(hs_ref[...].reshape(tt * bp, hp), w_o_ref[...],
                   preferred_element_type=jnp.float32)
           + b_o_ref[...])
    out_ref[...] = out.reshape(tt, bp, op).astype(out_ref.dtype)


# ---------------------------------------------------------------------------
# Parameter init (mirrors nn.Linear: uniform +-1/sqrt(fan_in)).
# ---------------------------------------------------------------------------
def init_params(key, input_size, hidden_size, output_size):
    ks = jax.random.split(key, 6)

    def lin(kw, kb, fan_in, fan_out):
        bound = 1.0 / (fan_in ** 0.5)
        w = jax.random.uniform(kw, (fan_in, fan_out), jnp.float32, -bound, bound)
        b = jax.random.uniform(kb, (fan_out,), jnp.float32, -bound, bound)
        return w, b

    wi, bi = lin(ks[0], ks[1], input_size, hidden_size)    # i2h
    wh, bh = lin(ks[2], ks[3], hidden_size, hidden_size)   # h2h
    wo, bo = lin(ks[4], ks[5], hidden_size, output_size)   # h2o
    return wi, bi, wh, bh, wo, bo


def pack_params(params, input_size, hidden_size, output_size):
    """Zero-pad hidden/output dims to 128 lanes; weights to bf16; fuse bi+bh.

    The input dim is kept at its natural width (i2h is a batched matmul now,
    so padding I only inflates HBM traffic and wasted K lanes).
    """
    wi, bi, wh, bh, wo, bo = params
    Hp = _round_up(hidden_size, LANE)
    Op = _round_up(output_size, LANE)

    w_ih = jnp.zeros((input_size, Hp), jnp.float32).at[:, :hidden_size].set(wi)
    w_hh = jnp.zeros((Hp, Hp), jnp.float32).at[:hidden_size, :hidden_size].set(wh)
    b_h = jnp.zeros((1, Hp), jnp.float32).at[0, :hidden_size].set(bi + bh)
    w_o = jnp.zeros((Hp, Op), jnp.float32).at[:hidden_size, :output_size].set(wo)
    b_o = jnp.zeros((1, Op), jnp.float32).at[0, :output_size].set(bo)

    packed = (w_ih.astype(jnp.bfloat16), w_hh.astype(jnp.bfloat16), b_h,
              w_o.astype(jnp.bfloat16), b_o)
    return packed, (input_size, hidden_size, output_size)


# ---------------------------------------------------------------------------
# Wrappers
# ---------------------------------------------------------------------------
@functools.partial(jax.jit, static_argnames=("dims", "block_steps"))
def rnn_sequence_forward(x_seq, h0, packed, dims, block_steps=4):
    """Run T RNN steps in ONE pallas_call (TT steps per grid iteration).

    x_seq: (T, B, I) f32,  h0: (B, H) f32.
    Returns (outputs (T, B, O) f32, final hidden (B, H) f32).
    """
    input_size, hidden_size, output_size = dims
    w_ih, w_hh, b_h, w_o, b_o = packed
    T, B, _ = x_seq.shape
    Hp = w_hh.shape[0]
    Op = w_o.shape[1]
    Bp = _round_up(max(B, BATCH_TILE), BATCH_TILE)

    TT = min(block_steps, T)
    T_pad = _round_up(T, TT)
    n_blocks = T_pad // TT

    # Batch padded to the native bf16 sublane tile; input dim left natural.
    x_p = jnp.zeros((T_pad, Bp, input_size), jnp.bfloat16)
    x_p = x_p.at[:T, :B, :].set(x_seq.astype(jnp.bfloat16))
    h0_p = jnp.zeros((Bp, Hp), jnp.float32).at[:B, :hidden_size].set(h0)

    kernel = functools.partial(rnn_block_kernel,
                               seq_len=T, need_mask=(T_pad != T))

    flops = int(2 * T_pad * Bp * (input_size * Hp + Hp * Hp + Hp * Op))
    bytes_accessed = int(
        x_p.size * 2 + h0_p.size * 4
        + (w_ih.size + w_hh.size + w_o.size) * 2
        + (b_h.size + b_o.size) * 4
        + T_pad * Bp * Op * 4 + Bp * Hp * 4)

    grid_spec = pltpu.PrefetchScalarGridSpec(
        num_scalar_prefetch=0,
        grid=(n_blocks,),
        in_specs=[
            pl.BlockSpec((TT, Bp, input_size), lambda g: (g, 0, 0)),  # x: streamed per block
            pl.BlockSpec((Bp, Hp), lambda g: (0, 0)),                 # h0: loaded once
            pl.BlockSpec((input_size, Hp), lambda g: (0, 0)),         # W_ih: resident
            pl.BlockSpec((1, Hp), lambda g: (0, 0)),                  # fused bias (bi+bh)
            pl.BlockSpec((Hp, Hp), lambda g: (0, 0)),                 # W_hh: resident
            pl.BlockSpec((Hp, Op), lambda g: (0, 0)),                 # W_o: resident
            pl.BlockSpec((1, Op), lambda g: (0, 0)),                  # b_o: resident
        ],
        out_specs=[
            pl.BlockSpec((TT, Bp, Op), lambda g: (g, 0, 0)),          # per-block outputs
            pl.BlockSpec((Bp, Hp), lambda g: (0, 0)),                 # hidden carry / final
        ],
        scratch_shapes=[pltpu.VMEM((TT, Bp, Hp), jnp.bfloat16)],      # stashed hidden states
    )

    out_p, h_p = pl.pallas_call(
        kernel,
        out_shape=(jax.ShapeDtypeStruct((T_pad, Bp, Op), jnp.float32),
                   jax.ShapeDtypeStruct((Bp, Hp), jnp.float32)),
        grid_spec=grid_spec,
        compiler_params=pltpu.CompilerParams(
            dimension_semantics=("arbitrary",)),
        cost_estimate=pl.CostEstimate(flops=flops,
                                      transcendentals=int(T_pad * Bp * Hp),
                                      bytes_accessed=bytes_accessed),
    )(x_p, h0_p, w_ih, b_h, w_hh, w_o, b_o)

    return out_p[:T, :B, :output_size], h_p[:B, :hidden_size]


def rnn_forward(x, h, packed, dims):
    """Exact single-step module semantics: (output, hidden) = forward(x, h)."""
    out_seq, h_new = rnn_sequence_forward(x[None], h, packed, dims, block_steps=1)
    return out_seq[0], h_new


# ---------------------------------------------------------------------------
# Pure-JAX references
# ---------------------------------------------------------------------------
def cell_reference(x, h, params, bf16):
    wi, bi, wh, bh, wo, bo = params
    cast = (lambda a: a.astype(jnp.bfloat16)) if bf16 else (lambda a: a)
    pre = (jnp.dot(cast(x), cast(wi), preferred_element_type=jnp.float32)
           + jnp.dot(cast(h), cast(wh), preferred_element_type=jnp.float32)
           + bi + bh)
    h_new = jnp.tanh(pre)
    out = jnp.dot(cast(h_new), cast(wo), preferred_element_type=jnp.float32) + bo
    return out, h_new


def rnn_reference(x_seq, h0, params, bf16):
    outs, h = [], h0
    for t in range(x_seq.shape[0]):
        o, h = cell_reference(x_seq[t], h, params, bf16)
        outs.append(o)
    return jnp.stack(outs), h


if __name__ == "__main__":
    input_size, hidden_size, output_size = 16, 32, 8
    batch, seq_len = 2, 8

    key = jax.random.PRNGKey(0)
    k_par, k_x = jax.random.split(key, 2)

    params = init_params(k_par, input_size, hidden_size, output_size)
    packed, dims = pack_params(params, input_size, hidden_size, output_size)

    x_seq = jax.random.normal(k_x, (seq_len, batch, input_size), jnp.float32)
    h0 = jnp.zeros((batch, hidden_size), jnp.float32)   # initHidden (broadcast over batch)

    # Full sequence (TT=4 steps per grid iteration).
    out_seq, h_final = rnn_sequence_forward(x_seq, h0, packed, dims, block_steps=4)
    jax.block_until_ready((out_seq, h_final))

    # Single step (exactly the PyTorch module forward).
    out1, h1 = rnn_forward(x_seq[0], h0, packed, dims)
    jax.block_until_ready((out1, h1))

    # Ragged length (exercises the padded-timestep mask path).
    out_r, h_r = rnn_sequence_forward(x_seq[:6], h0, packed, dims, block_steps=4)
    jax.block_until_ready((out_r, h_r))

    # Correctness: bf16-matched reference (tight) + fp32 reference (sanity).
    ref_out_b, ref_h_b = rnn_reference(x_seq, h0, params, bf16=True)
    ref_out_f, ref_h_f = rnn_reference(x_seq, h0, params, bf16=False)
    ref_o1, ref_h1 = cell_reference(x_seq[0], h0, params, bf16=True)
    ref_out_r, ref_h_r = rnn_reference(x_seq[:6], h0, params, bf16=True)

    assert jnp.allclose(out_seq, ref_out_b, atol=2e-3), "seq output mismatch"
    assert jnp.allclose(h_final, ref_h_b, atol=2e-3), "seq hidden mismatch"
    assert jnp.allclose(out1, ref_o1, atol=2e-3), "step output mismatch"
    assert jnp.allclose(h1, ref_h1, atol=2e-3), "step hidden mismatch"
    assert jnp.allclose(out_r, ref_out_r, atol=2e-3), "ragged output mismatch"
    assert jnp.allclose(h_r, ref_h_r, atol=2e-3), "ragged hidden mismatch"
    assert jnp.allclose(out_seq, ref_out_f, atol=5e-2), "fp32 sanity mismatch"
    assert jnp.allclose(h_final, ref_h_f, atol=5e-2), "fp32 sanity mismatch"

    print("KERNEL_OK")
</pallas_src>

<mosaic_0001>
module attributes {stable_mosaic.version = 11 : i64} {
  func.func @rnn_block_kernel(%arg0: i32, %arg1: memref<4x16x16xbf16, #tpu.memory_space<vmem>>, %arg2: memref<16x128xf32, #tpu.memory_space<vmem>>, %arg3: memref<16x128xbf16, #tpu.memory_space<vmem>>, %arg4: memref<1x128xf32, #tpu.memory_space<vmem>>, %arg5: memref<128x128xbf16, #tpu.memory_space<vmem>>, %arg6: memref<128x128xbf16, #tpu.memory_space<vmem>>, %arg7: memref<1x128xf32, #tpu.memory_space<vmem>>, %arg8: memref<4x16x128xf32, #tpu.memory_space<vmem>>, %arg9: memref<16x128xf32, #tpu.memory_space<vmem>>, %arg10: memref<4x16x128xbf16, #tpu.memory_space<vmem>>) attributes {dimension_semantics = [#tpu.dimension_semantics<arbitrary>], iteration_bounds = array<i64: 2>, scalar_prefetch = 0 : i64, scratch_operands = 1 : i64, tpu.core_type = #tpu.core_type<tc>, window_params = [{transform_indices = @transform_0, window_bounds = array<i64: 4, 16, 16>}, {pipeline_mode = #tpu.pipeline_mode<synchronous>, transform_indices = @transform_1, window_bounds = array<i64: 16, 128>}, {pipeline_mode = #tpu.pipeline_mode<synchronous>, transform_indices = @transform_2, window_bounds = array<i64: 16, 128>}, {pipeline_mode = #tpu.pipeline_mode<synchronous>, transform_indices = @transform_3, window_bounds = array<i64: 1, 128>}, {pipeline_mode = #tpu.pipeline_mode<synchronous>, transform_indices = @transform_4, window_bounds = array<i64: 128, 128>}, {pipeline_mode = #tpu.pipeline_mode<synchronous>, transform_indices = @transform_5, window_bounds = array<i64: 128, 128>}, {pipeline_mode = #tpu.pipeline_mode<synchronous>, transform_indices = @transform_6, window_bounds = array<i64: 1, 128>}, {transform_indices = @transform_7, window_bounds = array<i64: 4, 16, 128>}, {pipeline_mode = #tpu.pipeline_mode<synchronous>, transform_indices = @transform_8, window_bounds = array<i64: 16, 128>}]} {
    %c0_i32 = arith.constant 0 : i32
    %0 = arith.cmpi eq, %arg0, %c0_i32 : i32
    %1 = arith.extui %0 : i1 to i32
    %c0_i32_0 = arith.constant 0 : i32
    %2 = arith.cmpi ne, %1, %c0_i32_0 : i32
    scf.if %2 {
      %c0_43 = arith.constant 0 : index
      %c0_44 = arith.constant 0 : index
      %58 = vector.load %arg2[%c0_43, %c0_44] : memref<16x128xf32, #tpu.memory_space<vmem>>, vector<16x128xf32>
      %c0_45 = arith.constant 0 : index
      %c0_46 = arith.constant 0 : index
      %59 = vector.load %arg9[%c0_45, %c0_46] : memref<16x128xf32, #tpu.memory_space<vmem>>, vector<16x128xf32>
      tpu.vector_store %arg9[%c0_45, %c0_46], %58 {strides = array<i32>} : memref<16x128xf32, #tpu.memory_space<vmem>>, vector<16x128xf32>,
    } else {
    }
    %c0 = arith.constant 0 : index
    %c0_1 = arith.constant 0 : index
    %c0_2 = arith.constant 0 : index
    %3 = vector.load %arg1[%c0, %c0_1, %c0_2] : memref<4x16x16xbf16, #tpu.memory_space<vmem>>, vector<4x16x16xbf16>
    %4 = vector.shape_cast %3 : vector<4x16x16xbf16> to vector<64x16xbf16>
    %c0_3 = arith.constant 0 : index
    %c0_4 = arith.constant 0 : index
    %5 = vector.load %arg3[%c0_3, %c0_4] : memref<16x128xbf16, #tpu.memory_space<vmem>>, vector<16x128xbf16>
    %cst = arith.constant dense<0.000000e+00> : vector<64x128xf32>
    %6 = tpu.matmul %4, %5, %cst {dimension_numbers = #tpu.dot_dimension_numbers<[1], [0], [0], [1], [0, 0, 1, 1], [], []>} : vector<64x16xbf16>, vector<16x128xbf16>, vector<64x128xf32> -> vector<64x128xf32>
    %c0_5 = arith.constant 0 : index
    %c0_6 = arith.constant 0 : index
    %7 = vector.load %arg4[%c0_5, %c0_6] : memref<1x128xf32, #tpu.memory_space<vmem>>, vector<1x128xf32>
    %8 = vector.broadcast %7 : vector<1x128xf32> to vector<64x128xf32>
    %9 = arith.addf %6, %8 : vector<64x128xf32>
    %c0_7 = arith.constant 0 : index
    %c0_8 = arith.constant 0 : index
    %10 = vector.load %arg9[%c0_7, %c0_8] : memref<16x128xf32, #tpu.memory_space<vmem>>, vector<16x128xf32>
    %11 = arith.truncf %10 : vector<16x128xf32> to vector<16x128xbf16>
    %12 = vector.extract_strided_slice %9 {offsets = [0, 0], sizes = [16, 128], strides = [1, 1]} : vector<64x128xf32> to vector<16x128xf32>
    %c0_9 = arith.constant 0 : index
    %c0_10 = arith.constant 0 : index
    %13 = vector.load %arg5[%c0_9, %c0_10] : memref<128x128xbf16, #tpu.memory_space<vmem>>, vector<128x128xbf16>
    %cst_11 = arith.constant dense<0.000000e+00> : vector<16x128xf32>
    %14 = tpu.matmul %11, %13, %cst_11 {dimension_numbers = #tpu.dot_dimension_numbers<[1], [0], [0], [1], [0, 0, 1, 1], [], []>} : vector<16x128xbf16>, vector<128x128xbf16>, vector<16x128xf32> -> vector<16x128xf32>
    %15 = arith.addf %12, %14 : vector<16x128xf32>
    %16 = math.tanh %15 : vector<16x128xf32>
    %17 = arith.truncf %16 : vector<16x128xf32> to vector<16x128xbf16>
    %c0_12 = arith.constant 0 : index
    %c0_13 = arith.constant 0 : index
    %c0_14 = arith.constant 0 : index
    %18 = vector.load %arg10[%c0_12, %c0_13, %c0_14] : memref<4x16x128xbf16, #tpu.memory_space<vmem>>, vector<1x16x128xbf16>
    %19 = vector.shape_cast %18 : vector<1x16x128xbf16> to vector<16x128xbf16>
    %20 = vector.shape_cast %17 : vector<16x128xbf16> to vector<1x16x128xbf16>
    tpu.vector_store %arg10[%c0_12, %c0_13, %c0_14], %20 {strides = array<i32>} : memref<4x16x128xbf16, #tpu.memory_space<vmem>>, vector<1x16x128xbf16>,
    %21 = vector.extract_strided_slice %9 {offsets = [16, 0], sizes = [16, 128], strides = [1, 1]} : vector<64x128xf32> to vector<16x128xf32>
    %c0_15 = arith.constant 0 : index
    %c0_16 = arith.constant 0 : index
    %22 = vector.load %arg5[%c0_15, %c0_16] : memref<128x128xbf16, #tpu.memory_space<vmem>>, vector<128x128xbf16>
    %cst_17 = arith.constant dense<0.000000e+00> : vector<16x128xf32>
    %23 = tpu.matmul %17, %22, %cst_17 {dimension_numbers = #tpu.dot_dimension_numbers<[1], [0], [0], [1], [0, 0, 1, 1], [], []>} : vector<16x128xbf16>, vector<128x128xbf16>, vector<16x128xf32> -> vector<16x128xf32>
    %24 = arith.addf %21, %23 : vector<16x128xf32>
    %25 = math.tanh %24 : vector<16x128xf32>
    %26 = arith.truncf %25 : vector<16x128xf32> to vector<16x128xbf16>
    %c1 = arith.constant 1 : index
    %c0_18 = arith.constant 0 : index
    %c0_19 = arith.constant 0 : index
    %27 = vector.load %arg10[%c1, %c0_18, %c0_19] : memref<4x16x128xbf16, #tpu.memory_space<vmem>>, vector<1x16x128xbf16>
    %28 = vector.shape_cast %27 : vector<1x16x128xbf16> to vector<16x128xbf16>
    %29 = vector.shape_cast %26 : vector<16x128xbf16> to vector<1x16x128xbf16>
    tpu.vector_store %arg10[%c1, %c0_18, %c0_19], %29 {strides = array<i32>} : memref<4x16x128xbf16, #tpu.memory_space<vmem>>, vector<1x16x128xbf16>,
    %30 = vector.extract_strided_slice %9 {offsets = [32, 0], sizes = [16, 128], strides = [1, 1]} : vector<64x128xf32> to vector<16x128xf32>
    %c0_20 = arith.constant 0 : index
    %c0_21 = arith.constant 0 : index
    %31 = vector.load %arg5[%c0_20, %c0_21] : memref<128x128xbf16, #tpu.memory_space<vmem>>, vector<128x128xbf16>
    %cst_22 = arith.constant dense<0.000000e+00> : vector<16x128xf32>
    %32 = tpu.matmul %26, %31, %cst_22 {dimension_numbers = #tpu.dot_dimension_numbers<[1], [0], [0], [1], [0, 0, 1, 1], [], []>} : vector<16x128xbf16>, vector<128x128xbf16>, vector<16x128xf32> -> vector<16x128xf32>
    %33 = arith.addf %30, %32 : vector<16x128xf32>
    %34 = math.tanh %33 : vector<16x128xf32>
    %35 = arith.truncf %34 : vector<16x128xf32> to vector<16x128xbf16>
    %c2 = arith.constant 2 : index
    %c0_23 = arith.constant 0 : index
    %c0_24 = arith.constant 0 : index
    %36 = vector.load %arg10[%c2, %c0_23, %c0_24] : memref<4x16x128xbf16, #tpu.memory_space<vmem>>, vector<1x16x128xbf16>
    %37 = vector.shape_cast %36 : vector<1x16x128xbf16> to vector<16x128xbf16>
    %38 = vector.shape_cast %35 : vector<16x128xbf16> to vector<1x16x128xbf16>
    tpu.vector_store %arg10[%c2, %c0_23, %c0_24], %38 {strides = array<i32>} : memref<4x16x128xbf16, #tpu.memory_space<vmem>>, vector<1x16x128xbf16>,
    %39 = vector.extract_strided_slice %9 {offsets = [48, 0], sizes = [16, 128], strides = [1, 1]} : vector<64x128xf32> to vector<16x128xf32>
    %c0_25 = arith.constant 0 : index
    %c0_26 = arith.constant 0 : index
    %40 = vector.load %arg5[%c0_25, %c0_26] : memref<128x128xbf16, #tpu.memory_space<vmem>>, vector<128x128xbf16>
    %cst_27 = arith.constant dense<0.000000e+00> : vector<16x128xf32>
    %41 = tpu.matmul %35, %40, %cst_27 {dimension_numbers = #tpu.dot_dimension_numbers<[1], [0], [0], [1], [0, 0, 1, 1], [], []>} : vector<16x128xbf16>, vector<128x128xbf16>, vector<16x128xf32> -> vector<16x128xf32>
    %42 = arith.addf %39, %41 : vector<16x128xf32>
    %43 = math.tanh %42 : vector<16x128xf32>
    %44 = arith.truncf %43 : vector<16x128xf32> to vector<16x128xbf16>
    %c3 = arith.constant 3 : index
    %c0_28 = arith.constant 0 : index
    %c0_29 = arith.constant 0 : index
    %45 = vector.load %arg10[%c3, %c0_28, %c0_29] : memref<4x16x128xbf16, #tpu.memory_space<vmem>>, vector<1x16x128xbf16>
    %46 = vector.shape_cast %45 : vector<1x16x128xbf16> to vector<16x128xbf16>
    %47 = vector.shape_cast %44 : vector<16x128xbf16> to vector<1x16x128xbf16>
    tpu.vector_store %arg10[%c3, %c0_28, %c0_29], %47 {strides = array<i32>} : memref<4x16x128xbf16, #tpu.memory_space<vmem>>, vector<1x16x128xbf16>,
    %c0_30 = arith.constant 0 : index
    %c0_31 = arith.constant 0 : index
    %48 = vector.load %arg9[%c0_30, %c0_31] : memref<16x128xf32, #tpu.memory_space<vmem>>, vector<16x128xf32>
    tpu.vector_store %arg9[%c0_30, %c0_31], %43 {strides = array<i32>} : memref<16x128xf32, #tpu.memory_space<vmem>>, vector<16x128xf32>,
    %c0_32 = arith.constant 0 : index
    %c0_33 = arith.constant 0 : index
    %c0_34 = arith.constant 0 : index
    %49 = vector.load %arg10[%c0_32, %c0_33, %c0_34] : memref<4x16x128xbf16, #tpu.memory_space<vmem>>, vector<4x16x128xbf16>
    %50 = vector.shape_cast %49 : vector<4x16x128xbf16> to vector<64x128xbf16>
    %c0_35 = arith.constant 0 : index
    %c0_36 = arith.constant 0 : index
    %51 = vector.load %arg6[%c0_35, %c0_36] : memref<128x128xbf16, #tpu.memory_space<vmem>>, vector<128x128xbf16>
    %cst_37 = arith.constant dense<0.000000e+00> : vector<64x128xf32>
    %52 = tpu.matmul %50, %51, %cst_37 {dimension_numbers = #tpu.dot_dimension_numbers<[1], [0], [0], [1], [0, 0, 1, 1], [], []>} : vector<64x128xbf16>, vector<128x128xbf16>, vector<64x128xf32> -> vector<64x128xf32>
    %c0_38 = arith.constant 0 : index
    %c0_39 = arith.constant 0 : index
    %53 = vector.load %arg7[%c0_38, %c0_39] : memref<1x128xf32, #tpu.memory_space<vmem>>, vector<1x128xf32>
    %54 = vector.broadcast %53 : vector<1x128xf32> to vector<64x128xf32>
    %55 = arith.addf %52, %54 : vector<64x128xf32>
    %56 = vector.shape_cast %55 : vector<64x128xf32> to vector<4x16x128xf32>
    %c0_40 = arith.constant 0 : index
    %c0_41 = arith.constant 0 : index
    %c0_42 = arith.constant 0 : index
    %57 = vector.load %arg8[%c0_40, %c0_41, %c0_42] : memref<4x16x128xf32, #tpu.memory_space<vmem>>, vector<4x16x128xf32>
    tpu.vector_store %arg8[%c0_40, %c0_41, %c0_42], %56 {strides = array<i32>} : memref<4x16x128xf32, #tpu.memory_space<vmem>>, vector<4x16x128xf32>,
    return
  }
  func.func @transform_0(%arg0: i32) -> (i32, i32, i32) {
    %c0_i32 = arith.constant 0 : i32
    %c0_i32_0 = arith.constant 0 : i32
    %c0_i32_1 = arith.constant 0 : i32
    return %arg0, %c0_i32, %c0_i32_0 : i32, i32, i32
  }
  func.func @transform_1(%arg0: i32) -> (i32, i32) {
    %c0_i32 = arith.constant 0 : i32
    %c0_i32_0 = arith.constant 0 : i32
    %c0_i32_1 = arith.constant 0 : i32
    return %c0_i32, %c0_i32_0 : i32, i32
  }
  func.func @transform_2(%arg0: i32) -> (i32, i32) {
    %c0_i32 = arith.constant 0 : i32
    %c0_i32_0 = arith.constant 0 : i32
    %c0_i32_1 = arith.constant 0 : i32
    return %c0_i32, %c0_i32_0 : i32, i32
  }
  func.func @transform_3(%arg0: i32) -> (i32, i32) {
    %c0_i32 = arith.constant 0 : i32
    %c0_i32_0 = arith.constant 0 : i32
    %c0_i32_1 = arith.constant 0 : i32
    return %c0_i32, %c0_i32_0 : i32, i32
  }
  func.func @transform_4(%arg0: i32) -> (i32, i32) {
    %c0_i32 = arith.constant 0 : i32
    %c0_i32_0 = arith.constant 0 : i32
    %c0_i32_1 = arith.constant 0 : i32
    return %c0_i32, %c0_i32_0 : i32, i32
  }
  func.func @transform_5(%arg0: i32) -> (i32, i32) {
    %c0_i32 = arith.constant 0 : i32
    %c0_i32_0 = arith.constant 0 : i32
    %c0_i32_1 = arith.constant 0 : i32
    return %c0_i32, %c0_i32_0 : i32, i32
  }
  func.func @transform_6(%arg0: i32) -> (i32, i32) {
    %c0_i32 = arith.constant 0 : i32
    %c0_i32_0 = arith.constant 0 : i32
    %c0_i32_1 = arith.constant 0 : i32
    return %c0_i32, %c0_i32_0 : i32, i32
  }
  func.func @transform_7(%arg0: i32) -> (i32, i32, i32) {
    %c0_i32 = arith.constant 0 : i32
    %c0_i32_0 = arith.constant 0 : i32
    %c0_i32_1 = arith.constant 0 : i32
    return %arg0, %c0_i32, %c0_i32_0 : i32, i32, i32
  }
  func.func @transform_8(%arg0: i32) -> (i32, i32) {
    %c0_i32 = arith.constant 0 : i32
    %c0_i32_0 = arith.constant 0 : i32
    %c0_i32_1 = arith.constant 0 : i32
    return %c0_i32, %c0_i32_0 : i32, i32
  }
}

</mosaic_0001>

<bundles_post_ra>
// kernel: rnn_sequence_forward.1
= control target key start
LH: loop header
LB: loop body
LE: loop exit
PB: predicated region body
PF: predicated region fallthrough
CT: control target
= control target key end

     0   :  { %14 = vsyncpa [#allocation4], 0  ;;  %s1645_s27 = smov 0   ;;  %s1885_s0 = inlined_call_operand.vmem [shape: bf16[8,16,16], index: 0, kind: input, shape index: {}]   ;;  %s1886_s1 = inlined_call_operand.vmem [shape: f32[16,128], index: 1, kind: input, shape index: {}]   ;;  %s1887_s2 = inlined_call_operand.vmem [shape: bf16[16,128], index: 2, kind: input, shape index: {}]   ;;  %s1888_s3 = inlined_call_operand.vmem [shape: f32[1,128], index: 3, kind: input, shape index: {}]   ;;  %s1889_s4 = inlined_call_operand.vmem [shape: bf16[128,128], index: 4, kind: input, shape index: {}]   ;;  %s1890_s5 = inlined_call_operand.hbm [shape: bf16[128,128], index: 5, kind: input, shape index: {}]   ;;  %s1891_s6 = inlined_call_operand.vmem [shape: f32[1,128], index: 6, kind: input, shape index: {}]   ;;  %s1892_s7 = inlined_call_operand.vmem [shape: f32[8,16,128], index: 7, kind: output, shape index: {0}]   ;;  %s1893_s8 = inlined_call_operand.vmem [shape: f32[16,128], index: 8, kind: output, shape index: {1}]  }
   0x1 LB: > { %s1651_s28 = sadd.s32 4294967295, %s1593_s27   ;;  %p1195_p0 = scmp.ge.s32.totalorder %s1593_s27, 1  ;;  %s1593_s27 = sphi %s1645_s27, %s20_s27  }
   0x2   : > { %p224_p1 = scmp.lt.s32.totalorder %s1593_s27, 3  ;;  %s1595_s29 = smov [#allocation3]  }
   0x3   : > { %s248_s30 = sshll.u32 %s1595_s29, 4  ;;  %p1477_p4 = scmp.eq.s32.totalorder %s1651_s28, 0  ;;  %s249_s30 = int_to_ptr.vmem [resolvable:$true] %s248_s30 }
   0x4   : > { %p1656_p3 = pnand %p1195_p0, %p224_p1  ;;  %s1568_s10 = scalar_lea.vmem %s249_s30, 1024 }
   0x5   : > { %p1569_p8 = scmp.ne.s32.totalorder %s249_s30, %s1568_s10  ;;  %p1576_p11 = scmp.lt.s32.totalorder %s249_s30, %s249_s30 }
   0x6   : > { %p1473_p5 = pneg %p1656_p3  ;;  %p1577_p12 = scmp.lt.s32.totalorder %s1568_s10, %s1568_s10 }
   0x8   : > { %p1474_p6 = pnand %p1477_p4, %p1473_p5  ;;  %p1578_p13 = por %p1577_p12, %p1576_p11 }
   0xa   : > { %p1559_p7 = pneg %p1474_p6 }
   0xc   : > { %p1571_p9 = pnand %p1569_p8, %p1559_p7 }
   0xe   : > { %p1572_p10 = pneg %p1571_p9 }
  0x10   : > { %p1579_p2 = pnand %p1578_p13, %p1572_p10 }
  0x12   : > { %1582 = shalt.err (!%p1579_p2)
}
  0x13   : > { %s1596_s11 = smov 64   ;;  %s1597_s12 = smov 4  }
  0x14   : > { %1476 = dma.hbm_to_vmem [thread:$0]  (!%p1474_p6), %s1890_s5, 1024, %s249_s30, [#allocation4], %s1596_s11, %s1596_s11, %s1597_s12  }
  0x15   : > { %277 = sbr.rel (%p1656_p3) target bundleno = 1139 (0x473), region = 48 }
  0x1a   : > { %1588 = dma.done.wait (%p1477_p4), [#allocation4], 1024  }
  0x1b   : > { %1590 = vsyncadd (%p1477_p4), [#allocation4], 4294966272  ;;  %s1200_s15 = sshll.u32 %s1651_s28, 2  ;;  %p1895_p1 = scmp.ne.s32.totalorder %s1651_s28, 0 }
  0x1c   : > { %p314_p0 = scmp.lt.s32.totalorder %s1200_s15, 7 }
  0x1d   : > { %331 = sbr.rel (%p1895_p1) target bundleno = 36 (0x24), region = 56 }
  0x1e   : > { %s1897_s15 = smov (!%p314_p0, %s1200_s15), 7 }
  0x1f   : > { %s1272_s16 = sshll.u32 %s1897_s15, 3  ;;  %s1273_s17 = sshll.u32 %s1897_s15, 4 }
  0x20   : > { %s1678_s20 = scalar_lea.vmem %s1885_s0, %s1272_s16  ;;  %s1683_s23 = scalar_lea.vmem %s1892_s7, %s1273_s17 }
  0x22   : > { %v332_v0 = vld [vmem:[%s1886_s1] sm:$0xff]  ;;  %v333_v1 = vld [vmem:[%s1886_s1 + $0x8] sm:$0xff] }
  0x23   : > { %334 = vst [vmem:[%s1893_s8] sm:$0xff] %v332_v0  ;;  %335 = vst [vmem:[%s1893_s8 + $0x8] sm:$0xff] %v333_v1 }
  0x24 PF: > { %v1492_v2 = vld [vmem:[%s1889_s4 + $0x38] sm:$0xff]   ;;  %v1598_v3 = vmov 0.0   ;;  %v1493_v4 = vld [vmem:[%s1889_s4 + $0x30] sm:$0xff]   ;;  %vm1599_vm0 = vmmov 0   ;;  %v1494_v5 = vld [vmem:[%s1889_s4 + $0x28] sm:$0xff]   ;;  %vm379_vm1 = vcmask 130048  }
  0x25   : > { %1365 = vmatprep.subr.bf16.mxu0 %v1598_v3  ;;  %1381 = vmatprep.mubr.msk.bf16.mxu0 %vm1599_vm0, %v1598_v3  ;;  %v1497_v6 = vld [vmem:[%s1887_s2] sm:$0xff]   ;;  %v1500_v8 = vld [vmem:[%s1678_s20 + $0x8] sm:$0xff]   ;;  %v1496_v10 = vld [vmem:[%s1889_s4 + $0x18] sm:$0xff]  }
  0x26   : > { %1366 = vmatpush3.bf16.msra.mxu0 %v1492_v2  ;;  %v1498_v7 = vld [vmem:[%s1678_s20] sm:$0xff]   ;;  %1355 = vmatprep.subr.bf16.mxu1 %v1497_v6  ;;  %v1499_v11 = vld [vmem:[%s1889_s4 + $0x10] sm:$0xff]   ;;  %v1501_v12 = vld [vmem:[%s1889_s4 + $0x8] sm:$0xff]  }
  0x27   : > { %1367 = vmatprep.subr.bf16.mxu0 %v1598_v3  ;;  %1356 = vmatpush3.bf16.msra.mxu1 %v1497_v6  ;;  %v1495_v9 = vld [vmem:[%s1889_s4 + $0x20] sm:$0xff]   ;;  %v1503_v17 = vld [vmem:[%s1889_s4 + $0x38] sm:$0xff]   ;;  %v1504_v18 = vld [vmem:[%s1889_s4 + $0x30] sm:$0xff]  }
  0x28   : > { %1357 = vmatprep.mubr.msk.bf16.mxu1 %vm379_vm1, %v1498_v7  ;;  %1405 = vmatprep.subr.bf16.mxu1 %v1598_v3  ;;  %v1502_v13 = vld [vmem:[%s1889_s4] sm:$0xff]   ;;  %v1505_v19 = vld [vmem:[%s1889_s4 + $0x28] sm:$0xff]   ;;  %v1507_v21 = vld [vmem:[%s1889_s4 + $0x18] sm:$0xff]  }
  0x29   : > { %v1506_v20 = vld [vmem:[%s1889_s4 + $0x20] sm:$0xff]   ;;  %v1508_v22 = vld [vmem:[%s1889_s4 + $0x10] sm:$0xff]   ;;  %v1509_v23 = vld [vmem:[%s1889_s4 + $0x8] sm:$0xff]  }
  0x2a   : > { %1368 = vmatpush3.bf16.msra.mxu0 %v1493_v4  ;;  %1358 = vmatmul.mubr.msk.bf16.vlgmr.msra.gmra.mxu1 %vm379_vm1, %v1500_v8  ;;  %v457_v14 = vld [vmem:[%s1893_s8] sm:$0xff]  ;;  %v458_v15 = vld [vmem:[%s1893_s8 + $0x8] sm:$0xff]  ;;  %v1511_v25 = vld [vmem:[%s1889_s4 + $0x38] sm:$0xff]  }
  0x2b   : > { %1369 = vmatprep.subr.bf16.mxu0 %v1598_v3  ;;  %v459_v16 = vpack.c.bf16 %v458_v15, %v457_v14  ;;  %v1510_v24 = vld [vmem:[%s1889_s4] sm:$0xff]   ;;  %1406 = vmatpush3.bf16.msra.mxu1 %v1511_v25  ;;  %v1512_v26 = vld [vmem:[%s1889_s4 + $0x30] sm:$0xff]   ;;  %v1513_v27 = vld [vmem:[%s1889_s4 + $0x28] sm:$0xff]  }
  0x2c   : > { %1407 = vmatprep.subr.bf16.mxu1 %v1598_v3  ;;  %v1797_v31 = vld [vmem:[%s1888_s3] ss:$0 sm:$0xff]  ;;  %v1515_v45 = vld [vmem:[%s1889_s4 + $0x18] sm:$0xff]   ;;  %v1516_v46 = vld [vmem:[%s1678_s20 + $0x10] sm:$0xff]  }
  0x2d   : > { %v1514_v44 = vld [vmem:[%s1889_s4 + $0x20] sm:$0xff]   ;;  %v1517_v47 = vld [vmem:[%s1678_s20 + $0x18] sm:$0xff]   ;;  %v1518_v48 = vld [vmem:[%s1889_s4 + $0x10] sm:$0xff]   ;;  %1361 = vmatprep.mubr.msk.bf16.mxu1 %vm379_vm1, %v1516_v46 }
  0x2e   : > { %1370 = vmatpush3.bf16.msra.mxu0 %v1494_v5  ;;  %v1519_v49 = vld [vmem:[%s1889_s4 + $0x8] sm:$0xff]   ;;  %v1520_v50 = vld [vmem:[%s1889_s4] sm:$0xff]   ;;  %v1521_v51 = vld [vmem:[#allocation3 + $0x38] sm:$0xff]  }
  0x2f   : > { %1371 = vmatprep.subr.bf16.mxu0 %v1598_v3  ;;  %1408 = vmatpush3.bf16.msra.mxu1 %v1512_v26  ;;  %v1531_v52 = vld [vmem:[%s1889_s4 + $0x38] sm:$0xff]   ;;  %v1532_v53 = vld [vmem:[%s1889_s4 + $0x30] sm:$0xff]   ;;  %v1524_v4 = vld [vmem:[#allocation3 + $0x28] sm:$0xff]  }
  0x30   : > { %1409 = vmatprep.subr.bf16.mxu1 %v1598_v3  ;;  %v1523_v1 = vld [vmem:[#allocation3 + $0x30] sm:$0xff]   ;;  %v1525_v5 = vld [vmem:[#allocation3 + $0x20] sm:$0xff]   ;;  %v1526_v6 = vld [vmem:[#allocation3 + $0x18] sm:$0xff]  }
  0x31   : > { %v1527_v7 = vld [vmem:[#allocation3 + $0x10] sm:$0xff]   ;;  %v1528_v8 = vld [vmem:[#allocation3 + $0x8] sm:$0xff]  }
  0x32   : > { %1372 = vmatpush3.bf16.msra.mxu0 %v1495_v9  ;;  %1362 = vmatmul.mubr.msk.bf16.gmra.mxu1 %vm379_vm1, %v1517_v47  ;;  %v1529_v9 = vld [vmem:[#allocation3] sm:$0xff]   ;;  %v1536_v14 = vld [vmem:[%s1889_s4 + $0x10] sm:$0xff]   ;;  %v1537_v15 = vld [vmem:[%s1889_s4 + $0x8] sm:$0xff]  }
  0x33   : > { %1373 = vmatprep.subr.bf16.mxu0 %v1598_v3  ;;  %1410 = vmatpush3.bf16.msra.mxu1 %v1513_v27 }
  0x34   : > { %1411 = vmatprep.subr.bf16.mxu1 %v1598_v3  ;;  %1421 = vmatprep.mubr.msk.bf16.mxu1 %vm1599_vm0, %v1598_v3 }
  0x36   : > { %1374 = vmatpush3.bf16.msra.mxu0 %v1496_v10 }
  0x37   : > { %1375 = vmatprep.subr.bf16.mxu0 %v1598_v3  ;;  %1412 = vmatpush3.bf16.msra.mxu1 %v1514_v44 }
  0x38   : > { %1413 = vmatprep.subr.bf16.mxu1 %v1598_v3 }
  0x3a   : > { %1376 = vmatpush3.bf16.msra.mxu0 %v1499_v11  ;;  %v1533_v11 = vld [vmem:[%s1889_s4 + $0x28] sm:$0xff]  }
  0x3b   : > { %1377 = vmatprep.subr.bf16.mxu0 %v1598_v3  ;;  %1414 = vmatpush3.bf16.msra.mxu1 %v1515_v45 }
  0x3c   : > { %1415 = vmatprep.subr.bf16.mxu1 %v1598_v3 }
  0x3e   : > { %1378 = vmatpush3.bf16.msra.mxu0 %v1501_v12  ;;  %v1534_v12 = vld [vmem:[%s1889_s4 + $0x20] sm:$0xff]  }
  0x3f   : > { %1379 = vmatprep.subr.bf16.mxu0 %v1598_v3  ;;  %1416 = vmatpush3.bf16.msra.mxu1 %v1518_v48 }
  0x40   : > { %1417 = vmatprep.subr.bf16.mxu1 %v1598_v3 }
  0x42   : > { %1380 = vmatpush3.bf16.msra.mxu0 %v1502_v13  ;;  %v1535_v13 = vld [vmem:[%s1889_s4 + $0x18] sm:$0xff]  }
  0x43   : > { %1385 = vmatprep.subr.bf16.mxu0 %v1598_v3  ;;  %1418 = vmatpush3.bf16.msra.mxu1 %v1519_v49 }
  0x44   : > { %1419 = vmatprep.subr.bf16.mxu1 %v1598_v3 }
  0x45   : > { %1382 = vmatmul.mubr.bf16.vlgmr.msra.gmra.mxu0 %v459_v16  ;;  %v1538_v16 = vld [vmem:[%s1889_s4] sm:$0xff]  }
  0x46   : > { %1401 = vmatprep.mubr.msk.bf16.mxu0 %vm1599_vm0, %v1598_v3  ;;  %1386 = vmatpush3.bf16.msra.mxu0 %v1503_v17 }
  0x47   : > { %1387 = vmatprep.subr.bf16.mxu0 %v1598_v3  ;;  %1420 = vmatpush3.bf16.msra.mxu1 %v1520_v50 }
  0x48   : > { %1445 = vmatprep.subr.bf16.mxu1 %v1521_v51 }
  0x4a   : > { %1388 = vmatpush3.bf16.msra.mxu0 %v1504_v18 }
  0x4b   : > { %1389 = vmatprep.subr.bf16.mxu0 %v1598_v3 }
  0x4e   : > { %1390 = vmatpush3.bf16.msra.mxu0 %v1505_v19 }
  0x4f   : > { %1391 = vmatprep.subr.bf16.mxu0 %v1598_v3 }
  0x52   : > { %1392 = vmatpush3.bf16.msra.mxu0 %v1506_v20 }
  0x53   : > { %1393 = vmatprep.subr.bf16.mxu0 %v1598_v3 }
  0x56   : > { %1394 = vmatpush3.bf16.msra.mxu0 %v1507_v21 }
  0x57   : > { %1395 = vmatprep.subr.bf16.mxu0 %v1598_v3 }
  0x5a   : > { %1396 = vmatpush3.bf16.msra.mxu0 %v1508_v22 }
  0x5b   : > { %1397 = vmatprep.subr.bf16.mxu0 %v1598_v3 }
  0x5e   : > { %1398 = vmatpush3.bf16.msra.mxu0 %v1509_v23 }
  0x5f   : > { %1399 = vmatprep.subr.bf16.mxu0 %v1598_v3 }
  0x62   : > { %1400 = vmatpush3.bf16.msra.mxu0 %v1510_v24 }
  0x63   : > { %1425 = vmatprep.subr.bf16.mxu0 %v1598_v3 }
  0xea   : > { %v1359_v28 = vpop.f32.mrf.mxu1 }
  0xeb   : > { %v435_v54 = vadd.f32 %v1359_v28, %v1797_v31 }
  0xec   : > { %v426_v29 = vpop.f32.mrf.mxu1 }
  0xed   : > { %v427_v32 = vadd.f32 %v1797_v31, %v426_v29 }
  0xee   : > { %v1360_v30 = vpop.f32.mrf.mxu1 }
  0xef   : > { %v438_v58 = vadd.f32 %v1360_v30, %v1797_v31 }
  0xf0   : > { %v429_v33 = vpop.f32.mrf.mxu1 }
  0xf1   : > { %v430_v37 = vadd.f32 %v1797_v31, %v429_v33 }
  0xf2   : > { %v1363_v17 = vpop.f32.mrf.mxu1 }
  0xf4   : > { %v442_v18 = vpop.f32.mrf.mxu1 }
  0xf5   : > { %v443_v21 = vadd.f32 %v1797_v31, %v442_v18 }
  0xf6   : > { %v1364_v19 = vpop.f32.mrf.mxu1 }
  0xf7   : > { %v454_v46 = vadd.f32 %v1364_v19, %v1797_v31 }
  0xf8   : > { %v445_v20 = vpop.f32.mrf.mxu1 }
  0xf9   : > { %v446_v25 = vadd.f32 %v1797_v31, %v445_v20 }
 0x105   : > { %v558_v34 = vpop.f32.mrf.mxu0 }
 0x106   : > { %v565_v35 = vadd.f32 %v558_v34, %v427_v32  ;;  %v1257_v34 = vld [vmem:[%s1891_s6] ss:$0 sm:$0xff] }
 0x107   : > { %v1383_v36 = vpop.f32.mrf.mxu0 }
 0x108   : > { %1541 = vtanh.f32 %v565_v35 }
 0x109   : > { %v561_v38 = vpop.f32.mrf.mxu0 }
 0x10a   : > { %v566_v39 = vadd.f32 %v561_v38, %v430_v37 }
 0x10b   : > { %v1384_v40 = vpop.f32.mrf.mxu0 }
 0x10c   : > { %1543 = vtanh.f32 %v566_v39 }
 0x115   : > { %v1542_v41 = vpop.eup %1541 }
 0x119   : > { %v1544_v42 = vpop.eup %1543 }
 0x11a   : > { %v569_v43 = vpack.c.bf16 %v1544_v42, %v1542_v41  ;;  %v451_v42 = vadd.f32 %v1363_v17, %v1797_v31 }
 0x11c   : > { %1286 = vst [vmem:[#allocation2] sm:$0xff] %v569_v43   ;;  %1402 = vmatmul.mubr.bf16.vlgmr.msra.gmra.mxu0 %v569_v43 }
 0x11d   : > { %1441 = vmatprep.mubr.msk.bf16.mxu0 %vm1599_vm0, %v1598_v3  ;;  %1426 = vmatpush3.bf16.msra.mxu0 %v1531_v52 }
 0x11e   : > { %1427 = vmatprep.subr.bf16.mxu0 %v1598_v3 }
 0x121   : > { %1428 = vmatpush3.bf16.msra.mxu0 %v1532_v53 }
 0x122   : > { %1429 = vmatprep.subr.bf16.mxu0 %v1598_v3 }
 0x123   : > { %v1522_v2 = vld [vmem:[#allocation2] sm:$0xff]  }
 0x125   : > { %1430 = vmatpush3.bf16.msra.mxu0 %v1533_v11 }
 0x126   : > { %1431 = vmatprep.subr.bf16.mxu0 %v1598_v3 }
 0x129   : > { %1432 = vmatpush3.bf16.msra.mxu0 %v1534_v12 }
 0x12a   : > { %1433 = vmatprep.subr.bf16.mxu0 %v1598_v3 }
 0x12d   : > { %1434 = vmatpush3.bf16.msra.mxu0 %v1535_v13 }
 0x12e   : > { %1435 = vmatprep.subr.bf16.mxu0 %v1598_v3 }
 0x131   : > { %1436 = vmatpush3.bf16.msra.mxu0 %v1536_v14 }
 0x132   : > { %1437 = vmatprep.subr.bf16.mxu0 %v1598_v3 }
 0x135   : > { %1438 = vmatpush3.bf16.msra.mxu0 %v1537_v15 }
 0x136   : > { %1439 = vmatprep.subr.bf16.mxu0 %v1598_v3 }
 0x139   : > { %1440 = vmatpush3.bf16.msra.mxu0 %v1538_v16 }
 0x1dc   : > { %v677_v55 = vpop.f32.mrf.mxu0 }
 0x1dd   : > { %v684_v56 = vadd.f32 %v677_v55, %v435_v54 }
 0x1de   : > { %v1403_v57 = vpop.f32.mrf.mxu0 }
 0x1df   : > { %1545 = vtanh.f32 %v684_v56 }
 0x1e0   : > { %v680_v59 = vpop.f32.mrf.mxu0 }
 0x1e1   : > { %v685_v60 = vadd.f32 %v680_v59, %v438_v58 }
 0x1e2   : > { %v1404_v61 = vpop.f32.mrf.mxu0 }
 0x1e3   : > { %1547 = vtanh.f32 %v685_v60 }
 0x1ec   : > { %v1546_v62 = vpop.eup %1545 }
 0x1f0   : > { %v1548_v63 = vpop.eup %1547 }
 0x1f1   : > { %v688_v0 = vpack.c.bf16 %v1548_v63, %v1546_v62 }
 0x1f3   : > { %1291 = vst [vmem:[#allocation2 + $0x8] sm:$0xff] %v688_v0   ;;  %1422 = vmatmul.mubr.bf16.vlgmr.msra.gmra.mxu1 %v688_v0 }
 0x1f4   : > { %1446 = vmatpush3.bf16.msra.mxu1 %v1521_v51  ;;  %1461 = vmatprep.mubr.bf16.mxu1 %v1522_v2 }
 0x1f5   : > { %1447 = vmatprep.subr.bf16.mxu1 %v1523_v1 }
 0x1f8   : > { %1448 = vmatpush3.bf16.msra.mxu1 %v1523_v1 }
 0x1f9   : > { %1449 = vmatprep.subr.bf16.mxu1 %v1524_v4 }
 0x1fa   : > { %v1530_v10 = vld [vmem:[#allocation2 + $0x8] sm:$0xff]  }
 0x1fc   : > { %1450 = vmatpush3.bf16.msra.mxu1 %v1524_v4 }
 0x1fd   : > { %1451 = vmatprep.subr.bf16.mxu1 %v1525_v5 }
 0x200   : > { %1452 = vmatpush3.bf16.msra.mxu1 %v1525_v5 }
 0x201   : > { %1453 = vmatprep.subr.bf16.mxu1 %v1526_v6 }
 0x204   : > { %1454 = vmatpush3.bf16.msra.mxu1 %v1526_v6 }
 0x205   : > { %1455 = vmatprep.subr.bf16.mxu1 %v1527_v7 }
 0x208   : > { %1456 = vmatpush3.bf16.msra.mxu1 %v1527_v7 }
 0x209   : > { %1457 = vmatprep.subr.bf16.mxu1 %v1528_v8 }
 0x20c   : > { %1458 = vmatpush3.bf16.msra.mxu1 %v1528_v8 }
 0x20d   : > { %1459 = vmatprep.subr.bf16.mxu1 %v1529_v9 }
 0x210   : > { %1460 = vmatpush3.bf16.msra.mxu1 %v1529_v9 }
 0x213   : > { %1462 = vmatmul.mubr.bf16.vlgmr.msra.gmra.mxu1 %v1530_v10 }
 0x2b3   : > { %v797_v22 = vpop.f32.mrf.mxu1 }
 0x2b4   : > { %v804_v23 = vadd.f32 %v797_v22, %v443_v21 }
 0x2b5   : > { %v1423_v24 = vpop.f32.mrf.mxu1 }
 0x2b6   : > { %1549 = vtanh.f32 %v804_v23 }
 0x2b7   : > { %v800_v26 = vpop.f32.mrf.mxu1 }
 0x2b8   : > { %v805_v27 = vadd.f32 %v800_v26, %v446_v25 }
 0x2b9   : > { %v1424_v28 = vpop.f32.mrf.mxu1 }
 0x2ba   : > { %1551 = vtanh.f32 %v805_v27 }
 0x2c3   : > { %v1550_v3 = vpop.eup %1549 }
 0x2c7   : > { %v1552_v29 = vpop.eup %1551 }
 0x2c8   : > { %v808_v30 = vpack.c.bf16 %v1552_v29, %v1550_v3 }
 0x2ca   : > { %1296 = vst [vmem:[#allocation2 + $0x10] sm:$0xff] %v808_v30   ;;  %1442 = vmatmul.mubr.bf16.vlgmr.msra.gmra.mxu0 %v808_v30 }
 0x2d1   : > { %v1539_v32 = vld [vmem:[#allocation2 + $0x10] sm:$0xff]  }
 0x2d2   : > { %1465 = vmatprep.mubr.bf16.mxu1 %v1539_v32 }
 0x2d3   : > { %v1463_v33 = vpop.f32.mrf.mxu1 }
 0x2d4   : > { %v1087_v37 = vadd.f32 %v1463_v33, %v1257_v34 }
 0x2d5   : > { %v1078_v35 = vpop.f32.mrf.mxu1 }
 0x2d6   : > { %v1079_v36 = vadd.f32 %v1257_v34, %v1078_v35  ;;  %1111 = vst [vmem:[%s1683_s23 + $0x10] sm:$0xff] %v1087_v37 }
 0x2d7   : > { %v1464_v38 = vpop.f32.mrf.mxu1 }
 0x2d8   : > { %1109 = vst [vmem:[%s1683_s23] sm:$0xff] %v1079_v36  ;;  %v1090_v41 = vadd.f32 %v1464_v38, %v1257_v34 }
 0x2d9   : > { %v1081_v39 = vpop.f32.mrf.mxu1 }
 0x2da   : > { %v1082_v40 = vadd.f32 %v1257_v34, %v1081_v39  ;;  %1112 = vst [vmem:[%s1683_s23 + $0x18] sm:$0xff] %v1090_v41 }
 0x2dc   : > { %1110 = vst [vmem:[%s1683_s23 + $0x8] sm:$0xff] %v1082_v40 }
 0x38a   : > { %v917_v43 = vpop.f32.mrf.mxu0 }
 0x38b   : > { %v924_v44 = vadd.f32 %v917_v43, %v451_v42 }
 0x38c   : > { %v1443_v45 = vpop.f32.mrf.mxu0 }
 0x38d   : > { %1553 = vtanh.f32 %v924_v44 }
 0x38e   : > { %v920_v47 = vpop.f32.mrf.mxu0 }
 0x38f   : > { %v925_v48 = vadd.f32 %v920_v47, %v454_v46 }
 0x390   : > { %v1444_v49 = vpop.f32.mrf.mxu0 }
 0x391   : > { %1555 = vtanh.f32 %v925_v48 }
 0x39a   : > { %v1554_v50 = vpop.eup %1553 }
 0x39b   : > { %939 = vst [vmem:[%s1893_s8] sm:$0xff] %v1554_v50 }
 0x39e   : > { %v1556_v51 = vpop.eup %1555 }
 0x39f   : > { %v1300_v52 = vpack.c.bf16 %v1556_v51, %v1554_v50  ;;  %940 = vst [vmem:[%s1893_s8 + $0x8] sm:$0xff] %v1556_v51 }
 0x3a1   : > { %1301 = vst [vmem:[#allocation2 + $0x18] sm:$0xff] %v1300_v52  }
 0x3a8   : > { %v1540_v31 = vld [vmem:[#allocation2 + $0x18] sm:$0xff]  }
 0x3a9   : > { %1466 = vmatmul.mubr.bf16.gmra.mxu1 %v1540_v31 }
 0x469   : > { %v1467_v53 = vpop.f32.mrf.mxu1 }
 0x46a   : > { %v1103_v56 = vadd.f32 %v1467_v53, %v1257_v34 }
 0x46b   : > { %v1094_v54 = vpop.f32.mrf.mxu1 }
 0x46c   : > { %v1095_v55 = vadd.f32 %v1257_v34, %v1094_v54  ;;  %1115 = vst [vmem:[%s1683_s23 + $0x30] sm:$0xff] %v1103_v56 }
 0x46d   : > { %v1468_v57 = vpop.f32.mrf.mxu1 }
 0x46e   : > { %1113 = vst [vmem:[%s1683_s23 + $0x20] sm:$0xff] %v1095_v55  ;;  %v1106_v60 = vadd.f32 %v1468_v57, %v1257_v34 }
 0x46f   : > { %v1097_v58 = vpop.f32.mrf.mxu1 }
 0x470   : > { %v1098_v59 = vadd.f32 %v1257_v34, %v1097_v58  ;;  %1116 = vst [vmem:[%s1683_s23 + $0x38] sm:$0xff] %v1106_v60 }
 0x472   : > { %1114 = vst [vmem:[%s1683_s23 + $0x28] sm:$0xff] %v1098_v59 }
 0x473 PF: > { %s20_s27 = sadd.s32 1, %s1593_s27  }
 0x474   : > { %p17_p2 = scmp.ge.s32.totalorder %s20_s27, 4  }
 0x476   :  { %19 = sbr.rel (!%p17_p2) target bundleno = 1 (0x1), region = 98 }
 0x47b   :  { %1147 = vsyncpa [#allocation4], 1 }
 0x47c   :  { %1149 = vsyncpa [#allocation4 + $0x1], 1 }

</bundles_post_ra>
